<compile_context>
chip_gen: v6e
topology: v6e:2x2x1
jax: 0.10.0
libtpu: 0.0.40
codegen_flags: <defaults>
</compile_context>

<pallas_src>
import functools

import jax
import jax.numpy as jnp
from jax.experimental import pallas as pl
from jax.experimental.pallas import tpu as pltpu  # noqa: F401  (TPU backend)

LANE = 128
SUBLANE = 8


def _round_up(v, m):
    return (v + m - 1) // m * m


def _pad2(a, rows, cols):
    r, c = a.shape
    return jnp.pad(a.astype(jnp.float32), ((0, rows - r), (0, cols - c)))


# ------------------------------ fused Pallas kernel ------------------------------


def _gcn_fused_kernel(a_ref, x_ref, w1_ref, b1_ref, w2_ref, b2_ref, o_ref, *, n, out_dim):
    """Entire GCN forward in one kernel body (single block, no grid)."""
    a = a_ref[...]  # A_hat DMA'd once, reused by both aggregation matmuls.

    # ---- layer 1: A_hat @ (X @ W1) + b1, then ReLU (f32 MXU, f32 epilogue) ----
    xw = jnp.dot(x_ref[...], w1_ref[...], preferred_element_type=jnp.float32)
    h = jnp.dot(a, xw, preferred_element_type=jnp.float32) + b1_ref[...]
    h = jnp.maximum(h, 0.0)

    # TODO(synk): F.dropout(training=self.training) is identity in eval mode; a
    # training-mode p=0.5 mask would be fused right here on the in-register `h`
    # via pltpu.prng_seed + pltpu.prng_random_bits (no extra launch / HBM trip).

    # ---- layer 2: A_hat @ (H @ W2) + b2 ----
    hw = jnp.dot(h, w2_ref[...], preferred_element_type=jnp.float32)
    logits = jnp.dot(a, hw, preferred_element_type=jnp.float32) + b2_ref[...]

    # ---- row-wise log_softmax over the real out_dim lanes only (rest = padding) ----
    lane = jax.lax.broadcasted_iota(jnp.int32, logits.shape, 1)
    valid = lane < out_dim
    masked = jnp.where(valid, logits, jnp.float32(-jnp.inf))
    m = jnp.max(masked, axis=1, keepdims=True)
    s = logits - m
    e = jnp.exp(masked - m)                  # padded lanes: exp(-inf) == 0 exactly
    lse = jnp.log(jnp.sum(e, axis=1, keepdims=True))
    out = s - lse

    # Store only the real (n, out_dim) block — no wrapper slice needed.
    o_ref[...] = out[:n, :out_dim].astype(o_ref.dtype)


def make_gcn_forward(n, f_in, hidden, out_dim):
    """Build the fused pallas_call for (8,128)-aligned padded operand shapes."""
    n_p = _round_up(n, SUBLANE)
    f_p = _round_up(f_in, LANE)
    h_p = _round_up(hidden, LANE)
    o_p = _round_up(out_dim, LANE)

    flops = 2 * (n * f_in * hidden + n * n * hidden + n * hidden * out_dim + n * n * out_dim)
    transcendentals = n_p * o_p + n_p  # exp per (padded) logit + log per row
    bytes_accessed = 4 * (
        n_p * n_p + n_p * f_p + f_p * h_p + h_p + h_p * o_p + o_p + n * out_dim
    )

    kernel = functools.partial(_gcn_fused_kernel, n=n, out_dim=out_dim)
    call = pl.pallas_call(
        kernel,
        out_shape=jax.ShapeDtypeStruct((n, out_dim), jnp.float32),
        in_specs=[
            pl.BlockSpec((n_p, n_p), lambda: (0, 0)),
            pl.BlockSpec((n_p, f_p), lambda: (0, 0)),
            pl.BlockSpec((f_p, h_p), lambda: (0, 0)),
            pl.BlockSpec((1, h_p), lambda: (0, 0)),
            pl.BlockSpec((h_p, o_p), lambda: (0, 0)),
            pl.BlockSpec((1, o_p), lambda: (0, 0)),
        ],
        out_specs=pl.BlockSpec((n, out_dim), lambda: (0, 0)),
        cost_estimate=pl.CostEstimate(
            flops=flops, transcendentals=transcendentals, bytes_accessed=bytes_accessed
        ),
    )
    return call, (n_p, f_p, h_p, o_p)


def pad_gcn_inputs(a_hat, x, params, dims):
    """One-time (init-path) padding of all operands to aligned shapes."""
    n_p, f_p, h_p, o_p = dims
    return (
        _pad2(a_hat, n_p, n_p),
        _pad2(x, n_p, f_p),
        _pad2(params["w1"], f_p, h_p),
        _pad2(params["b1"], 1, h_p),
        _pad2(params["w2"], h_p, o_p),
        _pad2(params["b2"], 1, o_p),
    )


# --------------------------------- plain-JAX glue ---------------------------------


def build_normalized_adjacency(edge_index, num_nodes):
    """Dense D^{-1/2} (A + I) D^{-1/2} matching PyG gcn_norm (aggregate at dst)."""
    src, dst = edge_index[0], edge_index[1]
    a = jnp.zeros((num_nodes, num_nodes), jnp.float32)
    a = a.at[dst, src].add(1.0)                       # message src -> dst
    a = a + jnp.eye(num_nodes, dtype=jnp.float32)     # add self-loops
    deg = jnp.sum(a, axis=1)                          # in-degree (incl. self-loop)
    d_inv_sqrt = jnp.where(deg > 0, 1.0 / jnp.sqrt(deg), 0.0)
    return d_inv_sqrt[:, None] * a * d_inv_sqrt[None, :]


def init_params(key, input_dim, hidden_dim, output_dim):
    """Deterministic Glorot-uniform weights, zero bias (GCNConv default init)."""
    k1, k2 = jax.random.split(key)

    def glorot(k, fan_in, fan_out):
        limit = jnp.sqrt(6.0 / (fan_in + fan_out))
        return jax.random.uniform(k, (fan_in, fan_out), jnp.float32, -limit, limit)

    return {
        "w1": glorot(k1, input_dim, hidden_dim),
        "b1": jnp.zeros((1, hidden_dim), jnp.float32),
        "w2": glorot(k2, hidden_dim, output_dim),
        "b2": jnp.zeros((1, output_dim), jnp.float32),
    }


def _reference_forward(params, x, a_hat):
    hp = jax.lax.Precision.HIGHEST
    h = jnp.maximum(
        jnp.dot(a_hat, jnp.dot(x, params["w1"], precision=hp), precision=hp)
        + params["b1"],
        0.0,
    )
    h = (
        jnp.dot(a_hat, jnp.dot(h, params["w2"], precision=hp), precision=hp)
        + params["b2"]
    )
    return jax.nn.log_softmax(h, axis=1)


# -------------------------------------- main --------------------------------------

if __name__ == "__main__":
    num_nodes, input_dim, hidden_dim, output_dim = 32, 16, 32, 8

    key = jax.random.PRNGKey(0)
    kx, kp = jax.random.split(key)

    # Deterministic node features.
    x = jax.random.normal(kx, (num_nodes, input_dim), jnp.float32)

    # Deterministic graph: bidirectional ring (2 * num_nodes directed edges).
    idx = jnp.arange(num_nodes)
    src = jnp.concatenate([idx, (idx + 1) % num_nodes])
    dst = jnp.concatenate([(idx + 1) % num_nodes, idx])
    edge_index = jnp.stack([src, dst]).astype(jnp.int32)   # [2, 64]

    a_hat = build_normalized_adjacency(edge_index, num_nodes)
    params = init_params(kp, input_dim, hidden_dim, output_dim)

    # ---- init path (runs once): build the kernel and pre-pad every operand ----
    call, dims = make_gcn_forward(num_nodes, input_dim, hidden_dim, output_dim)
    a_p, x_p, w1_p, b1_p, w2_p, b2_p = jax.block_until_ready(
        pad_gcn_inputs(a_hat, x, params, dims)
    )

    # ---- hot path: exactly one launch (the fused Pallas kernel) ----
    gcn_forward = jax.jit(call)
    out = jax.block_until_ready(gcn_forward(a_p, x_p, w1_p, b1_p, w2_p, b2_p))

    ref = _reference_forward(params, x, a_hat)
    assert out.shape == (num_nodes, output_dim)
    assert jnp.allclose(out, ref, atol=1e-3, rtol=1e-3)
    assert bool(jnp.all(jnp.isfinite(out)))

    print("KERNEL_OK")
</pallas_src>

<mosaic_0001>
module attributes {stable_mosaic.version = 11 : i64} {
  func.func @_gcn_fused_kernel(%arg0: memref<32x32xf32, #tpu.memory_space<vmem>>, %arg1: memref<32x128xf32, #tpu.memory_space<vmem>>, %arg2: memref<128x128xf32, #tpu.memory_space<vmem>>, %arg3: memref<1x128xf32, #tpu.memory_space<vmem>>, %arg4: memref<128x128xf32, #tpu.memory_space<vmem>>, %arg5: memref<1x128xf32, #tpu.memory_space<vmem>>, %arg6: memref<32x8xf32, #tpu.memory_space<vmem>>) attributes {dimension_semantics = [], scalar_prefetch = 0 : i64, scratch_operands = 0 : i64, tpu.core_type = #tpu.core_type<tc>} {
    %c0 = arith.constant 0 : index
    %c0_0 = arith.constant 0 : index
    %0 = vector.load %arg0[%c0, %c0_0] : memref<32x32xf32, #tpu.memory_space<vmem>>, vector<32x32xf32>
    %c0_1 = arith.constant 0 : index
    %c0_2 = arith.constant 0 : index
    %1 = vector.load %arg1[%c0_1, %c0_2] : memref<32x128xf32, #tpu.memory_space<vmem>>, vector<32x128xf32>
    %c0_3 = arith.constant 0 : index
    %c0_4 = arith.constant 0 : index
    %2 = vector.load %arg2[%c0_3, %c0_4] : memref<128x128xf32, #tpu.memory_space<vmem>>, vector<128x128xf32>
    %cst = arith.constant dense<0.000000e+00> : vector<32x128xf32>
    %3 = tpu.matmul %1, %2, %cst {dimension_numbers = #tpu.dot_dimension_numbers<[1], [0], [0], [1], [0, 0, 1, 1], [], []>} : vector<32x128xf32>, vector<128x128xf32>, vector<32x128xf32> -> vector<32x128xf32>
    %cst_5 = arith.constant dense<0.000000e+00> : vector<32x128xf32>
    %4 = tpu.matmul %0, %3, %cst_5 {dimension_numbers = #tpu.dot_dimension_numbers<[1], [0], [0], [1], [0, 0, 1, 1], [], []>} : vector<32x32xf32>, vector<32x128xf32>, vector<32x128xf32> -> vector<32x128xf32>
    %c0_6 = arith.constant 0 : index
    %c0_7 = arith.constant 0 : index
    %5 = vector.load %arg3[%c0_6, %c0_7] : memref<1x128xf32, #tpu.memory_space<vmem>>, vector<1x128xf32>
    %6 = vector.broadcast %5 : vector<1x128xf32> to vector<32x128xf32>
    %7 = arith.addf %4, %6 : vector<32x128xf32>
    %cst_8 = arith.constant 0.000000e+00 : f32
    %8 = vector.broadcast %cst_8 : f32 to vector<32x128xf32>
    %9 = arith.maximumf %7, %8 : vector<32x128xf32>
    %c0_9 = arith.constant 0 : index
    %c0_10 = arith.constant 0 : index
    %10 = vector.load %arg4[%c0_9, %c0_10] : memref<128x128xf32, #tpu.memory_space<vmem>>, vector<128x128xf32>
    %cst_11 = arith.constant dense<0.000000e+00> : vector<32x128xf32>
    %11 = tpu.matmul %9, %10, %cst_11 {dimension_numbers = #tpu.dot_dimension_numbers<[1], [0], [0], [1], [0, 0, 1, 1], [], []>} : vector<32x128xf32>, vector<128x128xf32>, vector<32x128xf32> -> vector<32x128xf32>
    %cst_12 = arith.constant dense<0.000000e+00> : vector<32x128xf32>
    %12 = tpu.matmul %0, %11, %cst_12 {dimension_numbers = #tpu.dot_dimension_numbers<[1], [0], [0], [1], [0, 0, 1, 1], [], []>} : vector<32x32xf32>, vector<32x128xf32>, vector<32x128xf32> -> vector<32x128xf32>
    %c0_13 = arith.constant 0 : index
    %c0_14 = arith.constant 0 : index
    %13 = vector.load %arg5[%c0_13, %c0_14] : memref<1x128xf32, #tpu.memory_space<vmem>>, vector<1x128xf32>
    %14 = vector.broadcast %13 : vector<1x128xf32> to vector<32x128xf32>
    %15 = arith.addf %12, %14 : vector<32x128xf32>
    %16 = tpu.iota {dimensions = array<i32: 1>} : vector<32x128xi32>
    %c8_i32 = arith.constant 8 : i32
    %17 = vector.broadcast %c8_i32 : i32 to vector<32x128xi32>
    %18 = arith.cmpi slt, %16, %17 : vector<32x128xi32>
    %cst_15 = arith.constant 0xFF800000 : f32
    %19 = vector.broadcast %cst_15 : f32 to vector<32x128xf32>
    %20 = arith.select %18, %15, %19 : vector<32x128xi1>, vector<32x128xf32>
    %cst_16 = arith.constant dense<0xFF800000> : vector<32xf32>
    %21 = vector.multi_reduction <maximumf>, %20, %cst_16 [1] : vector<32x128xf32> to vector<32xf32>
    %22 = vector.shape_cast %21 : vector<32xf32> to vector<32x1xf32>
    %23 = vector.broadcast %22 : vector<32x1xf32> to vector<32x128xf32>
    %24 = arith.subf %15, %23 : vector<32x128xf32>
    %25 = vector.broadcast %22 : vector<32x1xf32> to vector<32x128xf32>
    %26 = arith.subf %20, %25 : vector<32x128xf32>
    %27 = math.exp %26 : vector<32x128xf32>
    %cst_17 = arith.constant dense<0.000000e+00> : vector<32xf32>
    %28 = vector.multi_reduction <add>, %27, %cst_17 [1] : vector<32x128xf32> to vector<32xf32>
    %29 = vector.shape_cast %28 : vector<32xf32> to vector<32x1xf32>
    %30 = math.log %29 : vector<32x1xf32>
    %31 = vector.broadcast %30 : vector<32x1xf32> to vector<32x128xf32>
    %32 = arith.subf %24, %31 : vector<32x128xf32>
    %33 = vector.extract_strided_slice %32 {offsets = [0, 0], sizes = [32, 8], strides = [1, 1]} : vector<32x128xf32> to vector<32x8xf32>
    %c0_18 = arith.constant 0 : index
    %c0_19 = arith.constant 0 : index
    %34 = vector.load %arg6[%c0_18, %c0_19] : memref<32x8xf32, #tpu.memory_space<vmem>>, vector<32x8xf32>
    tpu.vector_store %arg6[%c0_18, %c0_19], %33 {strides = array<i32>} : memref<32x8xf32, #tpu.memory_space<vmem>>, vector<32x8xf32>,
    return
  }
}

</mosaic_0001>

<bundles_post_ra>
// kernel: tpu_custom_call.1
= control target key start
LH: loop header
LB: loop body
LE: loop exit
PB: predicated region body
PF: predicated region fallthrough
CT: control target
= control target key end

     0   :  { %11 = vsyncpa [#allocation3], 0  ;;  %s937_s0 = inlined_call_operand.hbm [shape: f32[32,32], index: 0, kind: input, shape index: {}]   ;;  %s938_s1 = inlined_call_operand.hbm [shape: f32[32,128], index: 1, kind: input, shape index: {}]   ;;  %s939_s2 = inlined_call_operand.hbm [shape: f32[128,128], index: 2, kind: input, shape index: {}]   ;;  %s940_s3 = inlined_call_operand.vmem [shape: f32[1,128], index: 3, kind: input, shape index: {}]   ;;  %s941_s4 = inlined_call_operand.hbm [shape: f32[128,128], index: 4, kind: input, shape index: {}]   ;;  %s942_s5 = inlined_call_operand.vmem [shape: f32[1,128], index: 5, kind: input, shape index: {}]   ;;  %s943_s6 = inlined_call_operand.vmem [shape: f32[32,8], index: 6, kind: output, shape index: {}]  }
   0x1   :  { %12 = vsyncpa [#allocation5], 0 }
   0x2   :  { %13 = vsyncpa [#allocation8], 0  ;;  %s830_s21 = smov [#allocation4]   ;;  %s831_s23 = smov [#allocation2]  }
   0x3   :  { %s31_s22 = sshll.u32 %s830_s21, 4  ;;  %s19_s24 = sshll.u32 %s831_s23, 4  ;;  %s32_s22 = int_to_ptr.vmem [resolvable:$true] %s31_s22  ;;  %s20_s24 = int_to_ptr.vmem [resolvable:$true] %s19_s24 }
   0x4   :  { %s752_s25 = scalar_lea.vmem %s32_s22, 512  ;;  %p757_p1 = scmp.lt.s32.totalorder %s32_s22, %s32_s22 }
   0x5   :  { %p753_p0 = scmp.ne.s32.totalorder %s32_s22, %s752_s25  ;;  %p758_p2 = scmp.lt.s32.totalorder %s752_s25, %s752_s25 }
   0x7   :  { %p759_p3 = por %p758_p2, %p757_p1 }
   0x9   :  { %p760_p4 = pnand %p759_p3, %p753_p0 }
   0xb   :  { %763 = shalt.err (!%p760_p4)
}
   0xc   :  { %s832_s26 = smov 128   ;;  %s833_s27 = smov 8  }
   0xd   :  { %37 = dma.hbm_to_vmem [thread:$0]  %s938_s1, 512, %s32_s22, [#allocation5], %s832_s26, %s832_s26, %s833_s27  }
   0xe   :  { %s772_s30 = scalar_lea.vmem %s20_s24, 512  ;;  %p777_p6 = scmp.lt.s32.totalorder %s20_s24, %s20_s24 }
   0xf   :  { %p773_p5 = scmp.ne.s32.totalorder %s20_s24, %s772_s30  ;;  %p778_p7 = scmp.lt.s32.totalorder %s772_s30, %s772_s30 }
  0x11   :  { %p779_p8 = por %p778_p7, %p777_p6 }
  0x13   :  { %p780_p9 = pnand %p779_p8, %p773_p5 }
  0x15   :  { %783 = shalt.err (!%p780_p9)
}
  0x16   :  { %25 = dma.hbm_to_vmem [thread:$0]  %s937_s0, 512, %s20_s24, [#allocation3], %s832_s26, %s832_s26, %s833_s27  }
  0x17   :  { %s834_s9 = smov [#allocation6]   ;;  %s835_s11 = smov [#allocation7]  }
  0x18   :  { %s43_s10 = sshll.u32 %s834_s9, 4  ;;  %s57_s12 = sshll.u32 %s835_s11, 4  ;;  %s44_s10 = int_to_ptr.vmem [resolvable:$true] %s43_s10  ;;  %s58_s12 = int_to_ptr.vmem [resolvable:$true] %s57_s12 }
  0x19   :  { %s792_s1 = scalar_lea.vmem %s44_s10, 2048  ;;  %p797_p11 = scmp.lt.s32.totalorder %s44_s10, %s44_s10 }
  0x1a   :  { %p793_p10 = scmp.ne.s32.totalorder %s44_s10, %s792_s1  ;;  %p798_p12 = scmp.lt.s32.totalorder %s792_s1, %s792_s1 }
  0x1c   :  { %p799_p13 = por %p798_p12, %p797_p11 }
  0x1e   :  { %p800_p0 = pnand %p799_p13, %p793_p10 }
  0x20   :  { %803 = shalt.err (!%p800_p0)
}
  0x21   :  { %49 = dma.hbm_to_vmem [thread:$0]  %s939_s2, 2048, %s44_s10, [#allocation5], %s832_s26, %s832_s26, %s833_s27  }
  0x22   :  { %s812_s0 = scalar_lea.vmem %s58_s12, 2048  ;;  %p817_p2 = scmp.lt.s32.totalorder %s58_s12, %s58_s12 }
  0x23   :  { %p813_p1 = scmp.ne.s32.totalorder %s58_s12, %s812_s0  ;;  %p818_p3 = scmp.lt.s32.totalorder %s812_s0, %s812_s0 }
  0x25   :  { %p819_p4 = por %p818_p3, %p817_p2 }
  0x27   :  { %p820_p5 = pnand %p819_p4, %p813_p1 }
  0x29   :  { %823 = shalt.err (!%p820_p5)
}
  0x2a   :  { %63 = dma.hbm_to_vmem [thread:$0]  %s941_s4, 2048, %s58_s12, [#allocation8], %s832_s26, %s832_s26, %s833_s27  }
  0x2b   :  { %824 = dma.done.wait [#allocation3], 512  }
  0x2c   :  { %825 = vsyncadd [#allocation3], 4294966784 }
  0x2d   :  { %826 = dma.done.wait [#allocation5], 2560  }
  0x2e   :  { %827 = vsyncadd [#allocation5], 4294964736 }
  0x2f   :  { %828 = dma.done.wait [#allocation8], 2048  }
  0x30   :  { %829 = vsyncadd [#allocation8], 4294965248  ;;  %v101_v0 = vld [vmem:[#allocation6 + $0x78] sm:$0xff]  ;;  %v100_v1 = vld [vmem:[#allocation6 + $0x70] sm:$0xff]  ;;  %vm194_vm0 = vcmask 261120   ;;  %v489_v61 = vlaneseq  ;;  %vm540_vm2 = vcmask 64512  }
  0x31   :  { %618 = vmatprep.subr.mxu0 %v101_v0  ;;  %v99_v2 = vld [vmem:[#allocation6 + $0x68] sm:$0xff]  ;;  %v98_v3 = vld [vmem:[#allocation6 + $0x60] sm:$0xff]  ;;  %v97_v5 = vld [vmem:[#allocation6 + $0x58] sm:$0xff] }
  0x32   :  { %619 = vmatpush3.msra.mxu0 %v101_v0  ;;  %v82_v4 = vld [vmem:[#allocation4] sm:$0xff]  ;;  %v96_v6 = vld [vmem:[#allocation6 + $0x50] sm:$0xff]  ;;  %v95_v7 = vld [vmem:[#allocation6 + $0x48] sm:$0xff]  ;;  %v490_v63 = vand.u32 127, %v489_v61 }
  0x33   :  { %620 = vmatprep.subr.mxu0 %v100_v1  ;;  %650 = vmatprep.mubr.f32.mxu0 %v82_v4  ;;  %v94_v8 = vld [vmem:[#allocation6 + $0x40] sm:$0xff]  ;;  %v93_v9 = vld [vmem:[#allocation6 + $0x38] sm:$0xff]  ;;  %v92_v10 = vld [vmem:[#allocation6 + $0x30] sm:$0xff] }
  0x34   :  { %621 = vmatpush3.msra.mxu0 %v100_v1  ;;  %v91_v11 = vld [vmem:[#allocation6 + $0x28] sm:$0xff]  ;;  %v90_v12 = vld [vmem:[#allocation6 + $0x20] sm:$0xff]  ;;  %v89_v13 = vld [vmem:[#allocation6 + $0x18] sm:$0xff]  ;;  %vm491_vm1 = vcmp.lt.s32.totalorder %v490_v63, 8 }
  0x35   :  { %622 = vmatprep.subr.mxu0 %v99_v2  ;;  %v88_v14 = vld [vmem:[#allocation6 + $0x10] sm:$0xff]  ;;  %v87_v15 = vld [vmem:[#allocation6 + $0x8] sm:$0xff]  ;;  %v86_v16 = vld [vmem:[#allocation6] sm:$0xff] }
  0x36   :  { %623 = vmatpush3.msra.mxu0 %v99_v2  ;;  %v83_v17 = vld [vmem:[#allocation4 + $0x8] sm:$0xff]  ;;  %v84_v18 = vld [vmem:[#allocation4 + $0x10] sm:$0xff]  ;;  %v85_v19 = vld [vmem:[#allocation4 + $0x18] sm:$0xff] }
  0x37   :  { %624 = vmatprep.subr.mxu0 %v98_v3  ;;  %v78_v20 = vld [vmem:[#allocation2] sm:$0xff]  ;;  %v897_v25 = vld [vmem:[#allocation2 + $0x8] sm:$0xff]  ;;  %v311_v26 = vld [vmem:[#allocation7 + $0x78] sm:$0xff] }
  0x38   :  { %625 = vmatpush3.msra.mxu0 %v98_v3  ;;  %664 = vmatprep.mubr.msk.f32.mxu1 %vm194_vm0, %v78_v20  ;;  %v899_v27 = vld [vmem:[#allocation2 + $0x10] sm:$0xff]  ;;  %v905_v29 = vld [vmem:[#allocation2 + $0x18] sm:$0xff]  ;;  %v309_v30 = vld [vmem:[#allocation7 + $0x68] sm:$0xff] }
  0x39   :  { %626 = vmatprep.subr.mxu0 %v97_v5  ;;  %v310_v28 = vld [vmem:[#allocation7 + $0x70] sm:$0xff]  ;;  %v308_v31 = vld [vmem:[#allocation7 + $0x60] sm:$0xff]  ;;  %v307_v32 = vld [vmem:[#allocation7 + $0x58] sm:$0xff] }
  0x3a   :  { %627 = vmatpush3.msra.mxu0 %v97_v5  ;;  %v306_v33 = vld [vmem:[#allocation7 + $0x50] sm:$0xff]  ;;  %v305_v34 = vld [vmem:[#allocation7 + $0x48] sm:$0xff]  ;;  %v304_v35 = vld [vmem:[#allocation7 + $0x40] sm:$0xff] }
  0x3b   :  { %628 = vmatprep.subr.mxu0 %v96_v6  ;;  %v303_v36 = vld [vmem:[#allocation7 + $0x38] sm:$0xff]  ;;  %v302_v37 = vld [vmem:[#allocation7 + $0x30] sm:$0xff]  ;;  %v301_v38 = vld [vmem:[#allocation7 + $0x28] sm:$0xff] }
  0x3c   :  { %629 = vmatpush3.msra.mxu0 %v96_v6  ;;  %v300_v39 = vld [vmem:[#allocation7 + $0x20] sm:$0xff]  ;;  %v299_v40 = vld [vmem:[#allocation7 + $0x18] sm:$0xff]  ;;  %v298_v41 = vld [vmem:[#allocation7 + $0x10] sm:$0xff] }
  0x3d   :  { %630 = vmatprep.subr.mxu0 %v95_v7  ;;  %v297_v42 = vld [vmem:[#allocation7 + $0x8] sm:$0xff]  ;;  %v296_v43 = vld [vmem:[#allocation7] sm:$0xff] }
  0x3e   :  { %631 = vmatpush3.msra.mxu0 %v95_v7  ;;  %v552_v44 = vld [vmem:[%s940_s3] ss:$0 sm:$0xff] }
  0x3f   :  { %632 = vmatprep.subr.mxu0 %v94_v8  ;;  %v557_v0 = vld [vmem:[%s942_s5] ss:$0 sm:$0xff] }
  0x40   :  { %633 = vmatpush3.msra.mxu0 %v94_v8 }
  0x41   :  { %634 = vmatprep.subr.mxu0 %v93_v9 }
  0x42   :  { %635 = vmatpush3.msra.mxu0 %v93_v9 }
  0x43   :  { %636 = vmatprep.subr.mxu0 %v92_v10 }
  0x44   :  { %637 = vmatpush3.msra.mxu0 %v92_v10 }
  0x45   :  { %638 = vmatprep.subr.mxu0 %v91_v11 }
  0x46   :  { %639 = vmatpush3.msra.mxu0 %v91_v11 }
  0x47   :  { %640 = vmatprep.subr.mxu0 %v90_v12 }
  0x48   :  { %641 = vmatpush3.msra.mxu0 %v90_v12 }
  0x49   :  { %642 = vmatprep.subr.mxu0 %v89_v13 }
  0x4a   :  { %643 = vmatpush3.msra.mxu0 %v89_v13 }
  0x4b   :  { %644 = vmatprep.subr.mxu0 %v88_v14 }
  0x4c   :  { %645 = vmatpush3.msra.mxu0 %v88_v14 }
  0x4d   :  { %646 = vmatprep.subr.mxu0 %v87_v15 }
  0x4e   :  { %647 = vmatpush3.msra.mxu0 %v87_v15 }
  0x4f   :  { %648 = vmatprep.subr.mxu0 %v86_v16 }
  0x50   :  { %649 = vmatpush3.msra.mxu0 %v86_v16 }
  0x51   :  { %651 = vmatmul.mubr.f32.vlgmr.msra.gmra.mxu0 %v83_v17 }
  0x52   :  { %653 = vmatprep.mubr.f32.mxu0 %v84_v18 }
  0x55   :  { %654 = vmatmul.mubr.f32.gmra.mxu0 %v85_v19 }
  0x56   :  { %716 = vmatprep.mubr.msk.f32.mxu0 %vm194_vm0, %v78_v20 }
 0x111   :  { %v652_v21 = vpop.f32.mrf.mxu0 }
 0x113   :  { %v168_v22 = vpop.f32.mrf.mxu0 }
 0x115   :  { %v655_v23 = vpop.f32.mrf.mxu0 }
 0x116   :  { %656 = vmatprep.subr.mxu1 %v655_v23 }
 0x117   :  { %v178_v24 = vpop.f32.mrf.mxu0  ;;  %657 = vmatpush3.msra.mxu1 %v655_v23 }
 0x118   :  { %658 = vmatprep.subr.mxu1 %v178_v24 }
 0x119   :  { %659 = vmatpush3.msra.mxu1 %v178_v24 }
 0x11a   :  { %660 = vmatprep.subr.mxu1 %v652_v21 }
 0x11b   :  { %661 = vmatpush3.msra.mxu1 %v652_v21 }
 0x11c   :  { %662 = vmatprep.subr.mxu1 %v168_v22 }
 0x11d   :  { %663 = vmatpush3.msra.mxu1 %v168_v22 }
 0x11e   :  { %665 = vmatmul.mubr.msk.f32.vlgmr.msra.gmra.mxu1 %vm194_vm0, %v897_v25  ;;  %670 = vmatprep.subr.mxu1 %v311_v26 }
 0x11f   :  { %667 = vmatprep.mubr.msk.f32.mxu1 %vm194_vm0, %v899_v27  ;;  %671 = vmatpush3.msra.mxu1 %v311_v26 }
 0x120   :  { %672 = vmatprep.subr.mxu1 %v310_v28 }
 0x121   :  { %673 = vmatpush3.msra.mxu1 %v310_v28 }
 0x122   :  { %668 = vmatmul.mubr.msk.f32.gmra.mxu1 %vm194_vm0, %v905_v29  ;;  %674 = vmatprep.subr.mxu1 %v309_v30 }
 0x123   :  { %675 = vmatpush3.msra.mxu1 %v309_v30 }
 0x124   :  { %676 = vmatprep.subr.mxu1 %v308_v31 }
 0x125   :  { %677 = vmatpush3.msra.mxu1 %v308_v31 }
 0x126   :  { %678 = vmatprep.subr.mxu1 %v307_v32 }
 0x127   :  { %679 = vmatpush3.msra.mxu1 %v307_v32 }
 0x128   :  { %680 = vmatprep.subr.mxu1 %v306_v33 }
 0x129   :  { %681 = vmatpush3.msra.mxu1 %v306_v33 }
 0x12a   :  { %682 = vmatprep.subr.mxu1 %v305_v34 }
 0x12b   :  { %683 = vmatpush3.msra.mxu1 %v305_v34 }
 0x12c   :  { %684 = vmatprep.subr.mxu1 %v304_v35 }
 0x12d   :  { %685 = vmatpush3.msra.mxu1 %v304_v35 }
 0x12e   :  { %686 = vmatprep.subr.mxu1 %v303_v36 }
 0x12f   :  { %687 = vmatpush3.msra.mxu1 %v303_v36 }
 0x130   :  { %688 = vmatprep.subr.mxu1 %v302_v37 }
 0x131   :  { %689 = vmatpush3.msra.mxu1 %v302_v37 }
 0x132   :  { %690 = vmatprep.subr.mxu1 %v301_v38 }
 0x133   :  { %691 = vmatpush3.msra.mxu1 %v301_v38 }
 0x134   :  { %692 = vmatprep.subr.mxu1 %v300_v39 }
 0x135   :  { %693 = vmatpush3.msra.mxu1 %v300_v39 }
 0x136   :  { %694 = vmatprep.subr.mxu1 %v299_v40 }
 0x137   :  { %695 = vmatpush3.msra.mxu1 %v299_v40 }
 0x138   :  { %696 = vmatprep.subr.mxu1 %v298_v41 }
 0x139   :  { %697 = vmatpush3.msra.mxu1 %v298_v41 }
 0x13a   :  { %698 = vmatprep.subr.mxu1 %v297_v42 }
 0x13b   :  { %699 = vmatpush3.msra.mxu1 %v297_v42 }
 0x13c   :  { %700 = vmatprep.subr.mxu1 %v296_v43 }
 0x13d   :  { %701 = vmatpush3.msra.mxu1 %v296_v43 }
 0x1de   :  { %v666_v45 = vpop.f32.mrf.mxu1 }
 0x1df   :  { %v279_v46 = vadd.f32 %v666_v45, %v552_v44 }
 0x1e0   :  { %v273_v47 = vpop.f32.mrf.mxu1 }
 0x1e1   :  { %v274_v48 = vadd.f32 %v552_v44, %v273_v47  ;;  %v293_v51 = vmax.f32 %v279_v46, 0.0 }
 0x1e2   :  { %v669_v49 = vpop.f32.mrf.mxu1 }
 0x1e3   :  { %v292_v50 = vmax.f32 %v274_v48, 0.0  ;;  %v289_v52 = vadd.f32 %v669_v49, %v552_v44 }
 0x1e4   :  { %v283_v53 = vpop.f32.mrf.mxu1 }
 0x1e5   :  { %v284_v54 = vadd.f32 %v552_v44, %v283_v53  ;;  %702 = vmatprep.mubr.f32.mxu1 %v292_v50  ;;  %v295_v56 = vmax.f32 %v289_v52, 0.0 }
 0x1e6   :  { %703 = vmatmul.mubr.f32.vlgmr.msra.gmra.mxu1 %v293_v51 }
 0x1e7   :  { %v294_v55 = vmax.f32 %v284_v54, 0.0 }
 0x1e9   :  { %705 = vmatprep.mubr.f32.mxu1 %v294_v55 }
 0x1ea   :  { %706 = vmatmul.mubr.f32.gmra.mxu1 %v295_v56 }
 0x2a6   :  { %v704_v57 = vpop.f32.mrf.mxu1 }
 0x2a8   :  { %v378_v58 = vpop.f32.mrf.mxu1 }
 0x2aa   :  { %v707_v59 = vpop.f32.mrf.mxu1 }
 0x2ab   :  { %708 = vmatprep.subr.mxu0 %v707_v59 }
 0x2ac   :  { %v388_v60 = vpop.f32.mrf.mxu1  ;;  %709 = vmatpush3.msra.mxu0 %v707_v59 }
 0x2ad   :  { %710 = vmatprep.subr.mxu0 %v388_v60 }
 0x2ae   :  { %711 = vmatpush3.msra.mxu0 %v388_v60 }
 0x2af   :  { %712 = vmatprep.subr.mxu0 %v704_v57 }
 0x2b0   :  { %713 = vmatpush3.msra.mxu0 %v704_v57 }
 0x2b1   :  { %714 = vmatprep.subr.mxu0 %v378_v58 }
 0x2b2   :  { %715 = vmatpush3.msra.mxu0 %v378_v58 }
 0x2b3   :  { %717 = vmatmul.mubr.msk.f32.vlgmr.msra.gmra.mxu0 %vm194_vm0, %v897_v25 }
 0x2b4   :  { %719 = vmatprep.mubr.msk.f32.mxu0 %vm194_vm0, %v899_v27 }
 0x2b7   :  { %720 = vmatmul.mubr.msk.f32.gmra.mxu0 %vm194_vm0, %v905_v29 }
 0x373   :  { %v718_v62 = vpop.f32.mrf.mxu0 }
 0x374   :  { %v476_v4 = vadd.f32 %v718_v62, %v557_v0 }
 0x375   :  { %v470_v1 = vpop.f32.mrf.mxu0 }
 0x376   :  { %v471_v2 = vadd.f32 %v557_v0, %v470_v1  ;;  %v493_v10 = vsel %vm491_vm1, %v476_v4, -inf }
 0x377   :  { %v721_v3 = vpop.f32.mrf.mxu0 }
 0x378   :  { %v492_v5 = vsel %vm491_vm1, %v471_v2, -inf  ;;  %v486_v8 = vadd.f32 %v721_v3, %v557_v0 }
 0x379   :  { %v480_v6 = vpop.f32.mrf.mxu0  ;;  %496 = vmax.xlane.f32.xlu0 %v492_v5 }
 0x37a   :  { %v481_v7 = vadd.f32 %v557_v0, %v480_v6  ;;  %v495_v11 = vsel %vm491_vm1, %v486_v8, -inf }
 0x37c   :  { %v494_v9 = vsel %vm491_vm1, %v481_v7, -inf }
 0x37d   :  { %500 = vmax.xlane.f32.xlu1 %v494_v9  ;;  %498 = vmax.xlane.f32.xlu0 %v493_v10 }
 0x381   :  { %502 = vmax.xlane.f32.xlu1 %v495_v11 }
 0x402   :  { %v497_v12 = vpop.xlane.xlu0 %496 }
 0x403   :  { %v508_v13 = vsub.f32 %v492_v5, %v497_v12  ;;  %v504_v33 = vsub.f32 %v471_v2, %v497_v12 }
 0x405   :  { %v512_v14 = vmul.f32 1.442695, %v508_v13 }
 0x406   :  { %v501_v15 = vpop.xlane.xlu1 %500  ;;  %v499_v16 = vpop.xlane.xlu0 %498 }
 0x407   :  { %728 = vpow2.f32 %v512_v14  ;;  %v510_v17 = vsub.f32 %v494_v9, %v501_v15  ;;  %v509_v18 = vsub.f32 %v493_v10, %v499_v16  ;;  %v506_v38 = vsub.f32 %v481_v7, %v501_v15 }
 0x408   :  { %v505_v40 = vsub.f32 %v476_v4, %v499_v16 }
 0x409   :  { %v516_v19 = vmul.f32 1.442695, %v510_v17  ;;  %v514_v20 = vmul.f32 1.442695, %v509_v18 }
 0x40a   :  { %v503_v21 = vpop.xlane.xlu1 %502 }
 0x40b   :  { %730 = vpow2.f32 %v516_v19  ;;  %v511_v22 = vsub.f32 %v495_v11, %v503_v21  ;;  %v507_v45 = vsub.f32 %v486_v8, %v503_v21 }
 0x40c   :  { %732 = vpow2.f32 %v514_v20 }
 0x40d   :  { %v518_v23 = vmul.f32 1.442695, %v511_v22 }
 0x40f   :  { %734 = vpow2.f32 %v518_v23 }
 0x414   :  { %v729_v24 = vpop.eup %728 }
 0x415   :  { %520 = vadd.xlane.f32.xlu0 %v729_v24 }
 0x418   :  { %v731_v25 = vpop.eup %730 }
 0x419   :  { %v733_v26 = vpop.eup %732  ;;  %524 = vadd.xlane.f32.xlu0 %v731_v25 }
 0x41a   :  { %522 = vadd.xlane.f32.xlu1 %v733_v26 }
 0x41c   :  { %v735_v27 = vpop.eup %734 }
 0x41e   :  { %526 = vadd.xlane.f32.xlu1 %v735_v27 }
 0x49e   :  { %v521_v28 = vpop.xlane.xlu0 %520 }
 0x49f   :  { %736 = vlog2.f32 %v521_v28 }
 0x4a2   :  { %v525_v29 = vpop.xlane.xlu0 %524 }
 0x4a3   :  { %v523_v30 = vpop.xlane.xlu1 %522  ;;  %738 = vlog2.f32 %v525_v29 }
 0x4a4   :  { %740 = vlog2.f32 %v523_v30 }
 0x4a7   :  { %v527_v31 = vpop.xlane.xlu1 %526 }
 0x4a8   :  { %742 = vlog2.f32 %v527_v31 }
 0x4ac   :  { %v737_v32 = vpop.eup %736 }
 0x4ad   :  { %v529_v34 = vmul.f32 0.6931472, %v737_v32 }
 0x4af   :  { %v536_v35 = vsub.f32 %v504_v33, %v529_v34 }
 0x4b0   :  { %v739_v36 = vpop.eup %738 }
 0x4b1   :  { %v741_v37 = vpop.eup %740  ;;  %541 = vst.msk [vmem:[%s943_s6] sm:$0xff] %vm540_vm2, %v536_v35  ;;  %v533_v39 = vmul.f32 0.6931472, %v739_v36 }
 0x4b2   :  { %v531_v41 = vmul.f32 0.6931472, %v741_v37 }
 0x4b3   :  { %v538_v42 = vsub.f32 %v506_v38, %v533_v39 }
 0x4b4   :  { %v537_v43 = vsub.f32 %v505_v40, %v531_v41 }
 0x4b5   :  { %v743_v44 = vpop.eup %742  ;;  %543 = vst.msk [vmem:[%s943_s6 + $0x10] sm:$0xff] %vm540_vm2, %v538_v42 }
 0x4b6   :  { %542 = vst.msk [vmem:[%s943_s6 + $0x8] sm:$0xff] %vm540_vm2, %v537_v43  ;;  %v535_v46 = vmul.f32 0.6931472, %v743_v44 }
 0x4b8   :  { %v539_v47 = vsub.f32 %v507_v45, %v535_v46 }
 0x4ba   :  { %544 = vst.msk [vmem:[%s943_s6 + $0x18] sm:$0xff] %vm540_vm2, %v539_v47 }
 0x4bb   :  { %549 = vsyncpa [#allocation3], 1 }
 0x4bc   :  { %550 = vsyncpa [#allocation5], 1 }
 0x4bd   :  { %551 = vsyncpa [#allocation8], 1 }

</bundles_post_ra>
